<compile_context>
chip_gen: v6e
topology: v6e:2x2x1
jax: 0.10.0
libtpu: 0.0.40
codegen_flags: <defaults>
</compile_context>

<pallas_src>
import functools

import jax
import jax.numpy as jnp
from jax.experimental import pallas as pl
from jax.experimental.pallas import tpu as pltpu

_SQRT_HALF = 0.7071067811865476


def _erf_approx(z):
    # Abramowitz & Stegun 7.1.26 rational approximation (base |err| <= 1.5e-7);
    # the approx EUP reciprocal adds ~2^-12 rel error, still << 1e-4 tolerance.
    a1, a2, a3 = 0.254829592, -0.284496736, 1.421413741
    a4, a5, p = -1.453152027, 1.061405429, 0.3275911
    sgn = jnp.where(z >= 0.0, 1.0, -1.0)
    az = jnp.abs(z)
    t = pl.reciprocal(1.0 + p * az, approx=True)   # EUP op, frees VALU slots
    poly = ((((a5 * t + a4) * t + a3) * t + a2) * t + a1) * t
    return sgn * (1.0 - poly * jnp.exp(-az * az))


def _gelu_exact(x):
    # nn.GELU() default = exact erf formulation.
    return 0.5 * x * (1.0 + _erf_approx(x * _SQRT_HALF))


def _adapter_kernel(x_ref, w1_ref, b1_ref, w2_ref, b2_ref, o_ref, *,
                    skip_connect, h_chunk):
    # x_ref: (tm, Dp)   w1_ref: (Dp, Hp)   b1_ref: (1, Hp)
    # w2_ref: (Hp, Dp)  b2_ref: (1, Dp)    o_ref: (tm, Dp)
    x = x_ref[...]
    tm = x_ref.shape[0]
    Dp = o_ref.shape[1]
    Hp = w1_ref.shape[1]

    acc = jnp.zeros((tm, Dp), jnp.float32)
    # Static (trace-time) chunking over the hidden dim bounds the (tm, h_chunk)
    # f32 intermediates that must coexist in VMEM (matters for big Hp on v7x).
    for start in range(0, Hp, h_chunk):
        stop = min(start + h_chunk, Hp)
        h = jnp.dot(x, w1_ref[:, start:stop],
                    preferred_element_type=jnp.float32) + b1_ref[:, start:stop]
        a = _gelu_exact(h)
        acc = acc + jnp.dot(a.astype(w2_ref.dtype), w2_ref[start:stop, :],
                            preferred_element_type=jnp.float32)

    y = acc + b2_ref[...]
    if skip_connect:
        y = y + x.astype(jnp.float32)
    o_ref[...] = y.astype(o_ref.dtype)


def _round_up(a, b):
    return (a + b - 1) // b * b


def _choose_tm(M, block_m):
    """Pick the M tile. Guarantees >=2 grid steps when M > 8 so both v7x
    TensorCores get work; keeps tiles multiples of 8 (sublane) / 128 when big."""
    if M >= 2 * block_m:
        return block_m
    if M > 256:
        return _round_up(pl.cdiv(M, 2), 128)
    if M > 8:
        return _round_up(pl.cdiv(M, 2), 8)
    return _round_up(max(M, 1), 8)


def _vmem_limit_bytes(tm, Dp, Hp, h_chunk, x_itemsize, w_itemsize, weight_bufs):
    io = 2 * 2 * tm * Dp * x_itemsize                              # x + out, double-buffered
    wts = weight_bufs * (2 * Dp * Hp + Hp + Dp) * w_itemsize       # resident weights/biases
    scratch = (2 * tm * min(h_chunk, Hp) + 2 * tm * Dp) * 4        # h/gelu + f32 acc/y
    est = int(1.25 * (io + wts + scratch)) + (4 << 20)             # headroom for Mosaic internals
    cap = 128 << 20
    try:
        cap = int(pltpu.get_tpu_info().vmem_capacity_bytes)
    except Exception:
        pass
    return int(max(16 << 20, min(est, cap - (8 << 20))))


def _build_adapter_call(Mp, Dp, Hp, tm, out_dtype, skip_connect, h_chunk,
                        weight_buffers, cost, vmem_limit):
    kernel = functools.partial(_adapter_kernel, skip_connect=skip_connect,
                               h_chunk=h_chunk)
    w_mode = {} if weight_buffers is None else dict(
        pipeline_mode=pl.Buffered(weight_buffers))
    in_specs = [
        pl.BlockSpec((tm, Dp), lambda i: (i, 0)),              # x tile (double-buffered)
        pl.BlockSpec((Dp, Hp), lambda i: (0, 0), **w_mode),    # w1 (resident)
        pl.BlockSpec((1, Hp), lambda i: (0, 0), **w_mode),     # b1 (resident)
        pl.BlockSpec((Hp, Dp), lambda i: (0, 0), **w_mode),    # w2 (resident)
        pl.BlockSpec((1, Dp), lambda i: (0, 0), **w_mode),     # b2 (resident)
    ]
    return pl.pallas_call(
        kernel,
        out_shape=jax.ShapeDtypeStruct((Mp, Dp), out_dtype),
        grid_spec=pltpu.PrefetchScalarGridSpec(
            num_scalar_prefetch=0,
            grid=(Mp // tm,),
            in_specs=in_specs,
            out_specs=pl.BlockSpec((tm, Dp), lambda i: (i, 0)),
        ),
        compiler_params=pltpu.CompilerParams(
            dimension_semantics=("parallel",),
            vmem_limit_bytes=vmem_limit,
        ),
        cost_estimate=cost,
    )


def adapter_forward(x, w1, b1, w2, b2, *, skip_connect=True, block_m=512,
                    h_chunk=1024):
    """Adapter forward pass.

    x:  (..., D)
    w1: (D, H)  == torch fc1.weight.T      b1: (H,)
    w2: (H, D)  == torch fc2.weight.T      b2: (D,)
    Returns same shape as x.
    """
    orig_shape = x.shape
    D = orig_shape[-1]
    H = w1.shape[1]
    M = 1
    for s in orig_shape[:-1]:
        M *= s

    # Lane-dense feature dims; M tile chosen so the grid has >=2 steps when possible.
    Dp = _round_up(D, 128)
    Hp = _round_up(H, 128)
    tm = _choose_tm(M, block_m)
    Mp = _round_up(M, tm)
    h_chunk = _round_up(min(max(h_chunk, 128), Hp), 128)

    x2 = x.reshape(M, D)
    # Only materialize pads when dims are actually unaligned (no-op for 768/1024 etc.).
    if Mp != M or Dp != D:
        x2 = jnp.pad(x2, ((0, Mp - M), (0, Dp - D)))
    w1p = w1 if (Dp == D and Hp == H) else jnp.pad(w1, ((0, Dp - D), (0, Hp - H)))
    b1p = (b1 if Hp == H else jnp.pad(b1, (0, Hp - H))).reshape(1, Hp)
    w2p = w2 if (Dp == D and Hp == H) else jnp.pad(w2, ((0, Hp - H), (0, Dp - D)))
    b2p = (b2 if Dp == D else jnp.pad(b2, (0, Dp - D))).reshape(1, Dp)
    # Zero padding is exact: padded hidden units output gelu(0)=0 and hit zero rows
    # of w2; padded feature columns stay 0 and are sliced off below.

    x_item = jnp.dtype(x.dtype).itemsize
    w_item = jnp.dtype(w1.dtype).itemsize
    cost = pl.CostEstimate(
        flops=int(4 * Mp * Dp * Hp + 8 * Mp * Hp + 2 * Mp * Dp),
        transcendentals=int(2 * Mp * Hp),
        bytes_accessed=int(x_item * 2 * Mp * Dp + w_item * (2 * Dp * Hp + Hp + Dp)),
    )

    out = None
    last_err = None
    # Prefer single-buffered resident weights (constant index_map needs no double
    # buffer); fall back to the default pipelining if this jax rejects Buffered(1).
    for weight_bufs in (1, None):
        try:
            vmem_limit = _vmem_limit_bytes(
                tm, Dp, Hp, h_chunk, x_item, w_item,
                1 if weight_bufs == 1 else 2)
            call = _build_adapter_call(Mp, Dp, Hp, tm, x.dtype, skip_connect,
                                       h_chunk, weight_bufs, cost, vmem_limit)
            out = call(x2, w1p, b1p, w2p, b2p)
            break
        except Exception as e:  # retry with default (double) buffering
            last_err = e
    if out is None:
        raise last_err

    if Mp != M or Dp != D:
        out = out[:M, :D]
    return out.reshape(orig_shape)


def adapter_ref(x, w1, b1, w2, b2, skip_connect=True):
    """Pure-JAX reference matching the PyTorch Adapter.forward."""
    xs = jnp.matmul(x, w1) + b1
    xs = jax.nn.gelu(xs, approximate=False)     # nn.GELU() default (exact erf)
    xs = jnp.matmul(xs, w2) + b2
    return x + xs if skip_connect else xs


if __name__ == "__main__":
    # Small, module-consistent shapes: batch=2, seq=8, in_features=32,
    # hidden = int(32 * 0.25) = 8.
    B, N, D = 2, 8, 32
    H = int(D * 0.25)

    key = jax.random.PRNGKey(0)
    kx, k1, k2, k3, k4 = jax.random.split(key, 5)
    x = jax.random.normal(kx, (B, N, D), dtype=jnp.float32)
    w1 = jax.random.normal(k1, (D, H), dtype=jnp.float32) * 0.02   # fc1.weight.T
    b1 = jax.random.normal(k2, (H,), dtype=jnp.float32) * 0.02     # fc1.bias

    # Module-faithful init: fc2 weight and bias are zero-initialized.
    w2_zero = jnp.zeros((H, D), dtype=jnp.float32)
    b2_zero = jnp.zeros((D,), dtype=jnp.float32)
    out0 = jax.block_until_ready(
        adapter_forward(x, w1, b1, w2_zero, b2_zero, skip_connect=True))
    assert out0.shape == x.shape
    assert jnp.allclose(out0, adapter_ref(x, w1, b1, w2_zero, b2_zero, True),
                        atol=1e-4, rtol=1e-4), "mismatch (zero-init fc2)"

    # Non-trivial fc2 weights to exercise the full fused fc1->GELU->fc2->skip path.
    w2 = jax.random.normal(k3, (H, D), dtype=jnp.float32) * 0.02   # fc2.weight.T
    b2 = jax.random.normal(k4, (D,), dtype=jnp.float32) * 0.02     # fc2.bias
    out1 = jax.block_until_ready(
        adapter_forward(x, w1, b1, w2, b2, skip_connect=True))
    assert jnp.allclose(out1, adapter_ref(x, w1, b1, w2, b2, True),
                        atol=1e-4, rtol=1e-4), "mismatch (skip_connect=True)"

    out2 = jax.block_until_ready(
        adapter_forward(x, w1, b1, w2, b2, skip_connect=False))
    assert jnp.allclose(out2, adapter_ref(x, w1, b1, w2, b2, False),
                        atol=1e-4, rtol=1e-4), "mismatch (skip_connect=False)"

    # bf16 data path (MXU-native dtype; f32 accumulation inside the kernel).
    xb, w1b, b1b = x.astype(jnp.bfloat16), w1.astype(jnp.bfloat16), b1.astype(jnp.bfloat16)
    w2b, b2b = w2.astype(jnp.bfloat16), b2.astype(jnp.bfloat16)
    out3 = jax.block_until_ready(
        adapter_forward(xb, w1b, b1b, w2b, b2b, skip_connect=True))
    ref3 = adapter_ref(xb.astype(jnp.float32), w1b.astype(jnp.float32),
                       b1b.astype(jnp.float32), w2b.astype(jnp.float32),
                       b2b.astype(jnp.float32), True)
    assert out3.dtype == jnp.bfloat16
    assert jnp.allclose(out3.astype(jnp.float32), ref3,
                        atol=2e-2, rtol=2e-2), "mismatch (bf16 path)"

    print("KERNEL_OK")
</pallas_src>

<mosaic_0001>
module attributes {stable_mosaic.version = 11 : i64} {
  func.func @_adapter_kernel(%arg0: i32, %arg1: memref<8x128xf32, #tpu.memory_space<vmem>>, %arg2: memref<128x128xf32, #tpu.memory_space<vmem>>, %arg3: memref<1x128xf32, #tpu.memory_space<vmem>>, %arg4: memref<128x128xf32, #tpu.memory_space<vmem>>, %arg5: memref<1x128xf32, #tpu.memory_space<vmem>>, %arg6: memref<8x128xf32, #tpu.memory_space<vmem>>) attributes {dimension_semantics = [#tpu.dimension_semantics<parallel>], iteration_bounds = array<i64: 2>, scalar_prefetch = 0 : i64, scratch_operands = 0 : i64, tpu.core_type = #tpu.core_type<tc>, window_params = [{transform_indices = @transform_0, window_bounds = array<i64: 8, 128>}, {pipeline_mode = #tpu.pipeline_mode<synchronous>, transform_indices = @transform_1, window_bounds = array<i64: 128, 128>}, {pipeline_mode = #tpu.pipeline_mode<synchronous>, transform_indices = @transform_2, window_bounds = array<i64: 1, 128>}, {pipeline_mode = #tpu.pipeline_mode<synchronous>, transform_indices = @transform_3, window_bounds = array<i64: 128, 128>}, {pipeline_mode = #tpu.pipeline_mode<synchronous>, transform_indices = @transform_4, window_bounds = array<i64: 1, 128>}, {transform_indices = @transform_5, window_bounds = array<i64: 8, 128>}]} {
    %c0 = arith.constant 0 : index
    %c0_0 = arith.constant 0 : index
    %0 = vector.load %arg1[%c0, %c0_0] : memref<8x128xf32, #tpu.memory_space<vmem>>, vector<8x128xf32>
    %cst = arith.constant 0.000000e+00 : f32
    %1 = vector.broadcast %cst : f32 to vector<8x128xf32>
    %c0_1 = arith.constant 0 : index
    %c0_2 = arith.constant 0 : index
    %2 = vector.load %arg2[%c0_1, %c0_2] : memref<128x128xf32, #tpu.memory_space<vmem>>, vector<128x128xf32>
    %cst_3 = arith.constant dense<0.000000e+00> : vector<8x128xf32>
    %3 = tpu.matmul %0, %2, %cst_3 {dimension_numbers = #tpu.dot_dimension_numbers<[1], [0], [0], [1], [0, 0, 1, 1], [], []>} : vector<8x128xf32>, vector<128x128xf32>, vector<8x128xf32> -> vector<8x128xf32>
    %c0_4 = arith.constant 0 : index
    %c0_5 = arith.constant 0 : index
    %4 = vector.load %arg3[%c0_4, %c0_5] : memref<1x128xf32, #tpu.memory_space<vmem>>, vector<1x128xf32>
    %5 = vector.broadcast %4 : vector<1x128xf32> to vector<8x128xf32>
    %6 = arith.addf %3, %5 : vector<8x128xf32>
    %cst_6 = arith.constant 5.000000e-01 : f32
    %7 = vector.broadcast %cst_6 : f32 to vector<8x128xf32>
    %8 = arith.mulf %7, %6 : vector<8x128xf32>
    %cst_7 = arith.constant 0.707106769 : f32
    %9 = vector.broadcast %cst_7 : f32 to vector<8x128xf32>
    %10 = arith.mulf %6, %9 : vector<8x128xf32>
    %cst_8 = arith.constant 0.000000e+00 : f32
    %11 = vector.broadcast %cst_8 : f32 to vector<8x128xf32>
    %12 = arith.cmpf oge, %10, %11 : vector<8x128xf32>
    %cst_9 = arith.constant 1.000000e+00 : f32
    %cst_10 = arith.constant -1.000000e+00 : f32
    %13 = vector.broadcast %cst_9 : f32 to vector<8x128xf32>
    %14 = vector.broadcast %cst_10 : f32 to vector<8x128xf32>
    %15 = arith.select %12, %13, %14 : vector<8x128xi1>, vector<8x128xf32>
    %16 = math.absf %10 : vector<8x128xf32>
    %cst_11 = arith.constant 0.327591091 : f32
    %17 = vector.broadcast %cst_11 : f32 to vector<8x128xf32>
    %18 = arith.mulf %17, %16 : vector<8x128xf32>
    %cst_12 = arith.constant 1.000000e+00 : f32
    %19 = vector.broadcast %cst_12 : f32 to vector<8x128xf32>
    %20 = arith.addf %19, %18 : vector<8x128xf32>
    %21 = tpu.reciprocal %20 {approx = true} : vector<8x128xf32> -> vector<8x128xf32>
    %cst_13 = arith.constant 1.06140542 : f32
    %22 = vector.broadcast %cst_13 : f32 to vector<8x128xf32>
    %23 = arith.mulf %22, %21 : vector<8x128xf32>
    %cst_14 = arith.constant -1.45315206 : f32
    %24 = vector.broadcast %cst_14 : f32 to vector<8x128xf32>
    %25 = arith.addf %23, %24 : vector<8x128xf32>
    %26 = arith.mulf %25, %21 : vector<8x128xf32>
    %cst_15 = arith.constant 1.42141378 : f32
    %27 = vector.broadcast %cst_15 : f32 to vector<8x128xf32>
    %28 = arith.addf %26, %27 : vector<8x128xf32>
    %29 = arith.mulf %28, %21 : vector<8x128xf32>
    %cst_16 = arith.constant -0.284496725 : f32
    %30 = vector.broadcast %cst_16 : f32 to vector<8x128xf32>
    %31 = arith.addf %29, %30 : vector<8x128xf32>
    %32 = arith.mulf %31, %21 : vector<8x128xf32>
    %cst_17 = arith.constant 0.254829586 : f32
    %33 = vector.broadcast %cst_17 : f32 to vector<8x128xf32>
    %34 = arith.addf %32, %33 : vector<8x128xf32>
    %35 = arith.mulf %34, %21 : vector<8x128xf32>
    %cst_18 = arith.constant 0.000000e+00 : f32
    %36 = vector.broadcast %cst_18 : f32 to vector<8x128xf32>
    %37 = arith.subf %36, %16 : vector<8x128xf32>
    %38 = arith.mulf %37, %16 : vector<8x128xf32>
    %39 = math.exp %38 : vector<8x128xf32>
    %40 = arith.mulf %35, %39 : vector<8x128xf32>
    %cst_19 = arith.constant 1.000000e+00 : f32
    %41 = vector.broadcast %cst_19 : f32 to vector<8x128xf32>
    %42 = arith.subf %41, %40 : vector<8x128xf32>
    %43 = arith.mulf %15, %42 : vector<8x128xf32>
    %cst_20 = arith.constant 1.000000e+00 : f32
    %44 = vector.broadcast %cst_20 : f32 to vector<8x128xf32>
    %45 = arith.addf %44, %43 : vector<8x128xf32>
    %46 = arith.mulf %8, %45 : vector<8x128xf32>
    %c0_21 = arith.constant 0 : index
    %c0_22 = arith.constant 0 : index
    %47 = vector.load %arg4[%c0_21, %c0_22] : memref<128x128xf32, #tpu.memory_space<vmem>>, vector<128x128xf32>
    %cst_23 = arith.constant dense<0.000000e+00> : vector<8x128xf32>
    %48 = tpu.matmul %46, %47, %cst_23 {dimension_numbers = #tpu.dot_dimension_numbers<[1], [0], [0], [1], [0, 0, 1, 1], [], []>} : vector<8x128xf32>, vector<128x128xf32>, vector<8x128xf32> -> vector<8x128xf32>
    %49 = arith.addf %1, %48 : vector<8x128xf32>
    %c0_24 = arith.constant 0 : index
    %c0_25 = arith.constant 0 : index
    %50 = vector.load %arg5[%c0_24, %c0_25] : memref<1x128xf32, #tpu.memory_space<vmem>>, vector<1x128xf32>
    %51 = vector.broadcast %50 : vector<1x128xf32> to vector<8x128xf32>
    %52 = arith.addf %49, %51 : vector<8x128xf32>
    %53 = arith.addf %52, %0 : vector<8x128xf32>
    %c0_26 = arith.constant 0 : index
    %c0_27 = arith.constant 0 : index
    %54 = vector.load %arg6[%c0_26, %c0_27] : memref<8x128xf32, #tpu.memory_space<vmem>>, vector<8x128xf32>
    tpu.vector_store %arg6[%c0_26, %c0_27], %53 {strides = array<i32>} : memref<8x128xf32, #tpu.memory_space<vmem>>, vector<8x128xf32>,
    return
  }
  func.func @transform_0(%arg0: i32) -> (i32, i32) {
    %c0_i32 = arith.constant 0 : i32
    %c0_i32_0 = arith.constant 0 : i32
    return %arg0, %c0_i32 : i32, i32
  }
  func.func @transform_1(%arg0: i32) -> (i32, i32) {
    %c0_i32 = arith.constant 0 : i32
    %c0_i32_0 = arith.constant 0 : i32
    %c0_i32_1 = arith.constant 0 : i32
    return %c0_i32, %c0_i32_0 : i32, i32
  }
  func.func @transform_2(%arg0: i32) -> (i32, i32) {
    %c0_i32 = arith.constant 0 : i32
    %c0_i32_0 = arith.constant 0 : i32
    %c0_i32_1 = arith.constant 0 : i32
    return %c0_i32, %c0_i32_0 : i32, i32
  }
  func.func @transform_3(%arg0: i32) -> (i32, i32) {
    %c0_i32 = arith.constant 0 : i32
    %c0_i32_0 = arith.constant 0 : i32
    %c0_i32_1 = arith.constant 0 : i32
    return %c0_i32, %c0_i32_0 : i32, i32
  }
  func.func @transform_4(%arg0: i32) -> (i32, i32) {
    %c0_i32 = arith.constant 0 : i32
    %c0_i32_0 = arith.constant 0 : i32
    %c0_i32_1 = arith.constant 0 : i32
    return %c0_i32, %c0_i32_0 : i32, i32
  }
  func.func @transform_5(%arg0: i32) -> (i32, i32) {
    %c0_i32 = arith.constant 0 : i32
    %c0_i32_0 = arith.constant 0 : i32
    return %arg0, %c0_i32 : i32, i32
  }
}

module attributes {stable_mosaic.version = 11 : i64} {
  func.func @_adapter_kernel(%arg0: i32, %arg1: memref<8x128xf32, #tpu.memory_space<vmem>>, %arg2: memref<128x128xf32, #tpu.memory_space<vmem>>, %arg3: memref<1x128xf32, #tpu.memory_space<vmem>>, %arg4: memref<128x128xf32, #tpu.memory_space<vmem>>, %arg5: memref<1x128xf32, #tpu.memory_space<vmem>>, %arg6: memref<8x128xf32, #tpu.memory_space<vmem>>) attributes {dimension_semantics = [#tpu.dimension_semantics<parallel>], iteration_bounds = array<i64: 2>, scalar_prefetch = 0 : i64, scratch_operands = 0 : i64, tpu.core_type = #tpu.core_type<tc>, window_params = [{transform_indices = @transform_0, window_bounds = array<i64: 8, 128>}, {pipeline_mode = #tpu.pipeline_mode<synchronous>, transform_indices = @transform_1, window_bounds = array<i64: 128, 128>}, {pipeline_mode = #tpu.pipeline_mode<synchronous>, transform_indices = @transform_2, window_bounds = array<i64: 1, 128>}, {pipeline_mode = #tpu.pipeline_mode<synchronous>, transform_indices = @transform_3, window_bounds = array<i64: 128, 128>}, {pipeline_mode = #tpu.pipeline_mode<synchronous>, transform_indices = @transform_4, window_bounds = array<i64: 1, 128>}, {transform_indices = @transform_5, window_bounds = array<i64: 8, 128>}]} {
    %c0 = arith.constant 0 : index
    %c0_0 = arith.constant 0 : index
    %0 = vector.load %arg1[%c0, %c0_0] : memref<8x128xf32, #tpu.memory_space<vmem>>, vector<8x128xf32>
    %cst = arith.constant 0.000000e+00 : f32
    %1 = vector.broadcast %cst : f32 to vector<8x128xf32>
    %c0_1 = arith.constant 0 : index
    %c0_2 = arith.constant 0 : index
    %2 = vector.load %arg2[%c0_1, %c0_2] : memref<128x128xf32, #tpu.memory_space<vmem>>, vector<128x128xf32>
    %cst_3 = arith.constant dense<0.000000e+00> : vector<8x128xf32>
    %3 = tpu.matmul %0, %2, %cst_3 {dimension_numbers = #tpu.dot_dimension_numbers<[1], [0], [0], [1], [0, 0, 1, 1], [], []>} : vector<8x128xf32>, vector<128x128xf32>, vector<8x128xf32> -> vector<8x128xf32>
    %c0_4 = arith.constant 0 : index
    %c0_5 = arith.constant 0 : index
    %4 = vector.load %arg3[%c0_4, %c0_5] : memref<1x128xf32, #tpu.memory_space<vmem>>, vector<1x128xf32>
    %5 = vector.broadcast %4 : vector<1x128xf32> to vector<8x128xf32>
    %6 = arith.addf %3, %5 : vector<8x128xf32>
    %cst_6 = arith.constant 5.000000e-01 : f32
    %7 = vector.broadcast %cst_6 : f32 to vector<8x128xf32>
    %8 = arith.mulf %7, %6 : vector<8x128xf32>
    %cst_7 = arith.constant 0.707106769 : f32
    %9 = vector.broadcast %cst_7 : f32 to vector<8x128xf32>
    %10 = arith.mulf %6, %9 : vector<8x128xf32>
    %cst_8 = arith.constant 0.000000e+00 : f32
    %11 = vector.broadcast %cst_8 : f32 to vector<8x128xf32>
    %12 = arith.cmpf oge, %10, %11 : vector<8x128xf32>
    %cst_9 = arith.constant 1.000000e+00 : f32
    %cst_10 = arith.constant -1.000000e+00 : f32
    %13 = vector.broadcast %cst_9 : f32 to vector<8x128xf32>
    %14 = vector.broadcast %cst_10 : f32 to vector<8x128xf32>
    %15 = arith.select %12, %13, %14 : vector<8x128xi1>, vector<8x128xf32>
    %16 = math.absf %10 : vector<8x128xf32>
    %cst_11 = arith.constant 0.327591091 : f32
    %17 = vector.broadcast %cst_11 : f32 to vector<8x128xf32>
    %18 = arith.mulf %17, %16 : vector<8x128xf32>
    %cst_12 = arith.constant 1.000000e+00 : f32
    %19 = vector.broadcast %cst_12 : f32 to vector<8x128xf32>
    %20 = arith.addf %19, %18 : vector<8x128xf32>
    %21 = tpu.reciprocal %20 {approx = true} : vector<8x128xf32> -> vector<8x128xf32>
    %cst_13 = arith.constant 1.06140542 : f32
    %22 = vector.broadcast %cst_13 : f32 to vector<8x128xf32>
    %23 = arith.mulf %22, %21 : vector<8x128xf32>
    %cst_14 = arith.constant -1.45315206 : f32
    %24 = vector.broadcast %cst_14 : f32 to vector<8x128xf32>
    %25 = arith.addf %23, %24 : vector<8x128xf32>
    %26 = arith.mulf %25, %21 : vector<8x128xf32>
    %cst_15 = arith.constant 1.42141378 : f32
    %27 = vector.broadcast %cst_15 : f32 to vector<8x128xf32>
    %28 = arith.addf %26, %27 : vector<8x128xf32>
    %29 = arith.mulf %28, %21 : vector<8x128xf32>
    %cst_16 = arith.constant -0.284496725 : f32
    %30 = vector.broadcast %cst_16 : f32 to vector<8x128xf32>
    %31 = arith.addf %29, %30 : vector<8x128xf32>
    %32 = arith.mulf %31, %21 : vector<8x128xf32>
    %cst_17 = arith.constant 0.254829586 : f32
    %33 = vector.broadcast %cst_17 : f32 to vector<8x128xf32>
    %34 = arith.addf %32, %33 : vector<8x128xf32>
    %35 = arith.mulf %34, %21 : vector<8x128xf32>
    %cst_18 = arith.constant 0.000000e+00 : f32
    %36 = vector.broadcast %cst_18 : f32 to vector<8x128xf32>
    %37 = arith.subf %36, %16 : vector<8x128xf32>
    %38 = arith.mulf %37, %16 : vector<8x128xf32>
    %39 = math.exp %38 : vector<8x128xf32>
    %40 = arith.mulf %35, %39 : vector<8x128xf32>
    %cst_19 = arith.constant 1.000000e+00 : f32
    %41 = vector.broadcast %cst_19 : f32 to vector<8x128xf32>
    %42 = arith.subf %41, %40 : vector<8x128xf32>
    %43 = arith.mulf %15, %42 : vector<8x128xf32>
    %cst_20 = arith.constant 1.000000e+00 : f32
    %44 = vector.broadcast %cst_20 : f32 to vector<8x128xf32>
    %45 = arith.addf %44, %43 : vector<8x128xf32>
    %46 = arith.mulf %8, %45 : vector<8x128xf32>
    %c0_21 = arith.constant 0 : index
    %c0_22 = arith.constant 0 : index
    %47 = vector.load %arg4[%c0_21, %c0_22] : memref<128x128xf32, #tpu.memory_space<vmem>>, vector<128x128xf32>
    %cst_23 = arith.constant dense<0.000000e+00> : vector<8x128xf32>
    %48 = tpu.matmul %46, %47, %cst_23 {dimension_numbers = #tpu.dot_dimension_numbers<[1], [0], [0], [1], [0, 0, 1, 1], [], []>} : vector<8x128xf32>, vector<128x128xf32>, vector<8x128xf32> -> vector<8x128xf32>
    %49 = arith.addf %1, %48 : vector<8x128xf32>
    %c0_24 = arith.constant 0 : index
    %c0_25 = arith.constant 0 : index
    %50 = vector.load %arg5[%c0_24, %c0_25] : memref<1x128xf32, #tpu.memory_space<vmem>>, vector<1x128xf32>
    %51 = vector.broadcast %50 : vector<1x128xf32> to vector<8x128xf32>
    %52 = arith.addf %49, %51 : vector<8x128xf32>
    %53 = arith.addf %52, %0 : vector<8x128xf32>
    %c0_26 = arith.constant 0 : index
    %c0_27 = arith.constant 0 : index
    %54 = vector.load %arg6[%c0_26, %c0_27] : memref<8x128xf32, #tpu.memory_space<vmem>>, vector<8x128xf32>
    tpu.vector_store %arg6[%c0_26, %c0_27], %53 {strides = array<i32>} : memref<8x128xf32, #tpu.memory_space<vmem>>, vector<8x128xf32>,
    return
  }
  func.func @transform_0(%arg0: i32) -> (i32, i32) {
    %c0_i32 = arith.constant 0 : i32
    %c0_i32_0 = arith.constant 0 : i32
    return %arg0, %c0_i32 : i32, i32
  }
  func.func @transform_1(%arg0: i32) -> (i32, i32) {
    %c0_i32 = arith.constant 0 : i32
    %c0_i32_0 = arith.constant 0 : i32
    %c0_i32_1 = arith.constant 0 : i32
    return %c0_i32, %c0_i32_0 : i32, i32
  }
  func.func @transform_2(%arg0: i32) -> (i32, i32) {
    %c0_i32 = arith.constant 0 : i32
    %c0_i32_0 = arith.constant 0 : i32
    %c0_i32_1 = arith.constant 0 : i32
    return %c0_i32, %c0_i32_0 : i32, i32
  }
  func.func @transform_3(%arg0: i32) -> (i32, i32) {
    %c0_i32 = arith.constant 0 : i32
    %c0_i32_0 = arith.constant 0 : i32
    %c0_i32_1 = arith.constant 0 : i32
    return %c0_i32, %c0_i32_0 : i32, i32
  }
  func.func @transform_4(%arg0: i32) -> (i32, i32) {
    %c0_i32 = arith.constant 0 : i32
    %c0_i32_0 = arith.constant 0 : i32
    %c0_i32_1 = arith.constant 0 : i32
    return %c0_i32, %c0_i32_0 : i32, i32
  }
  func.func @transform_5(%arg0: i32) -> (i32, i32) {
    %c0_i32 = arith.constant 0 : i32
    %c0_i32_0 = arith.constant 0 : i32
    return %arg0, %c0_i32 : i32, i32
  }
}

</mosaic_0001>

<bundles_post_ra>
// kernel: tpu_custom_call.1
= control target key start
LH: loop header
LB: loop body
LE: loop exit
PB: predicated region body
PF: predicated region fallthrough
CT: control target
= control target key end

     0   :  { %10 = vsyncpa [#allocation3], 0  ;;  %s1190_s0 = inlined_call_operand.hbm [shape: f32[16,128], index: 0, kind: input, shape index: {}]   ;;  %s1191_s1 = inlined_call_operand.hbm [shape: f32[128,128], index: 1, kind: input, shape index: {}]   ;;  %s1192_s2 = inlined_call_operand.vmem [shape: f32[1,128], index: 2, kind: input, shape index: {}]   ;;  %s1193_s3 = inlined_call_operand.hbm [shape: f32[128,128], index: 3, kind: input, shape index: {}]   ;;  %s1194_s4 = inlined_call_operand.vmem [shape: f32[1,128], index: 4, kind: input, shape index: {}]   ;;  %s1195_s5 = inlined_call_operand.hbm [shape: f32[16,128], index: 5, kind: output, shape index: {}]  }
   0x1   :  { %12 = vsyncpa [#allocation3 + $0x1], 0 }
   0x2   :  { %13 = vsyncpa [#allocation6], 0 }
   0x3   :  { %14 = vsyncpa [#allocation4], 0 }
   0x4   :  { %16 = vsyncpa [#allocation4 + $0x1], 0  ;;  %s974_s18 = smov 0   ;;  %s976_s19 = smov 0  }
   0x5   :  { %s978_s20 = smov 0   ;;  %s980_s21 = smov 0  }
   0x6 LB: > { %s995_s22 = sadd.s32 4294967295, %s933_s21   ;;  %s587_s23 = sadd.s32 4294967294, %s933_s21   ;;  %s933_s21 = sphi %s980_s21, %s1217_s21   ;;  %s929_s20 = sphi %s978_s20, %s1216_s20   ;;  %s925_s19 = sphi %s976_s19, %s1215_s19   ;;  %s921_s18 = sphi %s974_s18, %s1214_s18  }
   0x7   : > { %p42_p0 = scmp.ne.s32.totalorder %s925_s19, %s921_s18  ;;  %p1196_p1 = scmp.eq.s32.totalorder %s995_s22, 0 }
   0x8   : > { %p156_p3 = scmp.eq.s32.totalorder %s587_s23, 1  ;;  %p588_p5 = scmp.ge.s32.totalorder %s933_s21, 1 }
   0x9   : > { %p1004_p4 = por %p1196_p1, %p42_p0  ;;  %p163_p7 = scmp.lt.s32.totalorder %s933_s21, 3 }
   0xa   : > { %p1009_p6 = por %p156_p3, %p42_p0  ;;  %s935_s27 = smov [#allocation5]  }
   0xb   : > { %s1200_s24 = scalar_select %p1004_p4, 1, 0 }
   0xc   : > { %s1201_s25 = scalar_select %p1009_p6, 1, 0 }
   0xd   : > { %p1014_p8 = pnand %p588_p5, %p163_p7  ;;  %s175_s28 = sshll.u32 %s935_s27, 4  ;;  %s176_s28 = int_to_ptr.vmem [resolvable:$true] %s175_s28 }
   0xe   : > { %s936_s30 = smov [#allocation7]   ;;  %s796_s7 = scalar_lea.vmem %s176_s28, 2048 }
   0xf   : > { %s1202_s26 = scalar_select %p1014_p8, 1, 0 }
  0x10   : > { %p721_p9 = pneg %p1014_p8  ;;  %s191_s6 = sshll.u32 %s936_s30, 4  ;;  %s192_s6 = int_to_ptr.vmem [resolvable:$true] %s191_s6 }
  0x11   : > { %p797_p13 = scmp.ne.s32.totalorder %s176_s28, %s796_s7  ;;  %p804_p5 = scmp.lt.s32.totalorder %s176_s28, %s176_s28 }
  0x12   : > { %p1023_p11 = pnand %p721_p9, %p1196_p1  ;;  %p805_p7 = scmp.lt.s32.totalorder %s796_s7, %s796_s7 }
  0x14   : > { %p787_p12 = pneg %p1023_p11  ;;  %p806_p10 = por %p805_p7, %p804_p5 }
  0x16   : > { %p799_p0 = pnand %p797_p13, %p787_p12 }
  0x18   : > { %p800_p3 = pneg %p799_p0 }
  0x1a   : > { %p807_p9 = pnand %p806_p10, %p800_p3 }
  0x1c   : > { %810 = shalt.err (!%p807_p9)
}
  0x1d   : > { %s937_s8 = smov 128   ;;  %s938_s9 = smov 8  }
  0x1e   : > { %724 = dma.hbm_to_vmem [thread:$0]  (!%p1023_p11), %s1191_s1, 2048, %s176_s28, [#allocation6], %s937_s8, %s937_s8, %s938_s9  }
  0x1f   : > { %s822_s12 = scalar_lea.vmem %s192_s6, 2048  ;;  %p830_p2 = scmp.lt.s32.totalorder %s192_s6, %s192_s6 }
  0x20   : > { %p823_p1 = scmp.ne.s32.totalorder %s192_s6, %s822_s12  ;;  %p831_p6 = scmp.lt.s32.totalorder %s822_s12, %s822_s12 }
  0x22   : > { %p825_p13 = pnand %p823_p1, %p787_p12  ;;  %p832_p5 = por %p831_p6, %p830_p2 }
  0x24   : > { %p826_p0 = pneg %p825_p13 }
  0x26   : > { %p833_p10 = pnand %p832_p5, %p826_p0 }
  0x28   : > { %836 = shalt.err (!%p833_p10)
}
  0x29   : > { %727 = dma.hbm_to_vmem [thread:$0]  (!%p1023_p11), %s1193_s3, 2048, %s192_s6, [#allocation6], %s937_s8, %s937_s8, %s938_s9  }
  0x2a   : > { %s1046_s15 = sadd.s32 1, %s933_s21   ;;  %s29_s16 = sadd.s32 1, %s929_s20 }
  0x2b   : > { %s26_s17 = ssub.s32 %s933_s21, %s1046_s15  ;;  %p36_p1 = scmp.ne.s32.totalorder %s929_s20, %s925_s19 }
  0x2c   : > { %p27_p2 = scmp.eq.s32.totalorder %s26_s17, 0  ;;  %p37_p6 = scmp.eq.s32.totalorder %s933_s21, 0 }
  0x2d   : > { %p1204_p12 = scmp.eq.s32.totalorder %s995_s22, 1  ;;  %p738_p7 = scmp.lt.s32.totalorder %s933_s21, 2 }
  0x2e   : > { %s1062_s27 = scalar_select %p27_p2, %s929_s20, %s29_s16  }
  0x2f   : > { %p1056_p3 = por %p1204_p12, %p36_p1  ;;  %p38_p9 = por %p37_p6, %p36_p1 }
  0x30   : > { %s208_s28 = sand.u32 1, %s929_s20   ;;  %s593_s30 = sshll.u32 %s933_s21, 7 }
  0x31   : > { %s1205_s23 = scalar_select %p1056_p3, 1, 0 }
  0x32   : > { %s592_s29 = sshll.u32 %s208_s28, 3  ;;  %s1069_s8 = scalar_lea.hbm %s1190_s0, %s593_s30 }
  0x33   : > { %s212_s9 = scalar_lea.vmem [#allocation2], %s592_s29  ;;  %p1071_p11 = pnand %p738_p7, %p38_p9 }
  0x34   : > { %s219_s10 = sshll.u32 %s212_s9, 4  ;;  %s209_s12 = scalar_lea.sflag [#allocation3], %s208_s28  ;;  %s220_s10 = int_to_ptr.vmem [resolvable:$true] %s219_s10 }
  0x35   : > { %s837_s13 = scalar_lea.hbm %s1069_s8, 128  ;;  %p839_p0 = pneg %p1071_p11 }
  0x36   : > { %p838_p13 = scmp.ne.s32.totalorder %s1069_s8, %s837_s13  ;;  %s842_s17 = scalar_lea.hbm %s1190_s0, 256 }
  0x37   : > { %p843_p1 = scmp.lt.s32.totalorder %s1069_s8, %s1190_s0  ;;  %p844_p2 = scmp.lt.s32.totalorder %s842_s17, %s837_s13 }
  0x38   : > { %p840_p5 = pnand %p839_p0, %p838_p13 }
  0x39   : > { %p845_p6 = por %p844_p2, %p843_p1 }
  0x3a   : > { %p841_p10 = pneg %p840_p5 }
  0x3c   : > { %p846_p12 = pnand %p845_p6, %p841_p10 }
  0x3e   : > { %849 = shalt.err (!%p846_p12)
}
  0x3f   : > { %s850_s6 = scalar_lea.vmem %s220_s10, 128  ;;  %s939_s28 = smov [#allocation2]  }
  0x40   : > { %p851_p7 = scmp.ne.s32.totalorder %s220_s10, %s850_s6  ;;  %s855_s7 = sshll.u32 %s939_s28, 4  ;;  %s856_s7 = int_to_ptr.vmem [resolvable:$false] %s855_s7 }
  0x41   : > { %s857_s9 = scalar_lea.vmem %s856_s7, 256  ;;  %p858_p13 = scmp.lt.s32.totalorder %s220_s10, %s856_s7 }
  0x42   : > { %p853_p9 = pnand %p851_p7, %p839_p0  ;;  %p859_p5 = scmp.lt.s32.totalorder %s857_s9, %s850_s6 }
  0x44   : > { %p854_p3 = pneg %p853_p9  ;;  %p860_p4 = por %p859_p5, %p858_p13 }
  0x46   : > { %p861_p8 = pnand %p860_p4, %p854_p3 }
  0x48   : > { %864 = shalt.err (!%p861_p8)
}
  0x49   : > { %731 = dma.hbm_to_vmem [thread:$0]  (!%p1071_p11), %s1069_s8, 128, %s220_s10, %s209_s12  }
  0x4a   : > { %p1207_p10 = scmp.ne.s32.totalorder %s1202_s26, 0 }
  0x4b   : > { %s1092_s13 = sand.u32 (!%p1207_p10), 1, %s925_s19   ;;  %p1208_p4 = scmp.ne.s32.totalorder (!%p1207_p10), %s1200_s24, 0 }
  0x4c   : > { %228 = sbr.rel (%p1207_p10) target bundleno = 574 (0x23e), region = 40  ;;  %s595_s14 = sshll.u32 (!%p1207_p10), %s1092_s13, 3 }
  0x4d   : > { %s231_s16 = scalar_lea.sflag (!%p1207_p10), [#allocation3], %s1092_s13  ;;  %s1098_s17 = scalar_lea.vmem (!%p1207_p10), [#allocation2], %s595_s14 }
  0x51   : > { %908 = dma.done.wait (%p1208_p4), %s231_s16, 128  }
  0x52   : > { %910 = vsyncadd (%p1208_p4), %s231_s16, 4294967168  ;;  %p1209_p8 = scmp.eq.s32.totalorder %s995_s22, 0 }
  0x54   : > { %912 = dma.done.wait (%p1209_p8), [#allocation6], 4096   ;;  %p1210_p3 = pmov %p1209_p8 }
  0x55   : > { %v940_v0 = vmov 0.0   ;;  %vm941_vm0 = vmmov 0   ;;  %v285_v1 = vld [vmem:[#allocation5 + $0x78] sm:$0xff]  ;;  %v284_v2 = vld [vmem:[#allocation5 + $0x70] sm:$0xff]  ;;  %v283_v3 = vld [vmem:[#allocation5 + $0x68] sm:$0xff]  ;;  %v942_v58 = vmov -1.0  }
  0x56   : > { %914 = vsyncadd (%p1210_p3), [#allocation6], 4294963200  ;;  %639 = vmatprep.subr.mxu0 %v940_v0  ;;  %671 = vmatprep.mubr.msk.f32.mxu0 %vm941_vm0, %v940_v0  ;;  %v282_v4 = vld [vmem:[#allocation5 + $0x60] sm:$0xff]  ;;  %v281_v5 = vld [vmem:[#allocation5 + $0x58] sm:$0xff]  ;;  %s602_s11 = sshll.u32 %s995_s22, 7  ;;  %s268_s12 = scalar_lea.vmem [#allocation8], %s595_s14 }
  0x57   : > { %674 = vmatprep.subr.mxu1 %v940_v0  ;;  %706 = vmatprep.mubr.msk.f32.mxu1 %vm941_vm0, %v940_v0  ;;  %v280_v6 = vld [vmem:[#allocation5 + $0x50] sm:$0xff]  ;;  %v279_v7 = vld [vmem:[#allocation5 + $0x48] sm:$0xff]  ;;  %v278_v8 = vld [vmem:[#allocation5 + $0x40] sm:$0xff]  ;;  %s498_s30 = sshll.u32 %s268_s12, 4  ;;  %s496_s28 = scalar_lea.hbm %s1195_s5, %s602_s11  ;;  %s499_s30 = int_to_ptr.vmem [resolvable:$true] %s498_s30 }
  0x58   : > { %640 = vmatpush3.msra.mxu0 %v285_v1  ;;  %v277_v9 = vld [vmem:[#allocation5 + $0x38] sm:$0xff]  ;;  %v276_v10 = vld [vmem:[#allocation5 + $0x30] sm:$0xff]  ;;  %v275_v11 = vld [vmem:[#allocation5 + $0x28] sm:$0xff]  ;;  %s485_s7 = scalar_lea.sflag [#allocation4], %s1092_s13  ;;  %s865_s9 = scalar_lea.vmem %s499_s30, 128 }
  0x59   : > { %641 = vmatprep.subr.mxu0 %v940_v0  ;;  %v274_v12 = vld [vmem:[#allocation5 + $0x20] sm:$0xff]  ;;  %v273_v13 = vld [vmem:[#allocation5 + $0x18] sm:$0xff]  ;;  %v272_v14 = vld [vmem:[#allocation5 + $0x10] sm:$0xff]  ;;  %p866_p11 = scmp.ne.s32.totalorder %s499_s30, %s865_s9  ;;  %p1211_p0 = scmp.ne.s32.totalorder %s1205_s23, 0 }
  0x5a   : > { %642 = vmatpush3.msra.mxu0 %v284_v2  ;;  %v271_v15 = vld [vmem:[#allocation5 + $0x8] sm:$0xff]  ;;  %v270_v16 = vld [vmem:[#allocation5] sm:$0xff]  ;;  %v1127_v17 = vld [vmem:[%s1098_s17] sm:$0xff]  ;;  %s943_s22 = smov [#allocation8]  }
  0x5b   : > { %643 = vmatprep.subr.mxu0 %v940_v0  ;;  %v404_v18 = vld [vmem:[#allocation7 + $0x78] sm:$0xff]  ;;  %v403_v19 = vld [vmem:[#allocation7 + $0x70] sm:$0xff]  ;;  %v402_v20 = vld [vmem:[#allocation7 + $0x68] sm:$0xff]  ;;  %p867_p1 = pnand %p866_p11, %p1211_p0  ;;  %s869_s16 = sshll.u32 %s943_s22, 4  ;;  %s870_s16 = int_to_ptr.vmem [resolvable:$false] %s869_s16 }
  0x5c   : > { %644 = vmatpush3.msra.mxu0 %v283_v3  ;;  %675 = vmatpush3.msra.mxu1 %v404_v18  ;;  %v401_v21 = vld [vmem:[#allocation7 + $0x60] sm:$0xff]  ;;  %v400_v22 = vld [vmem:[#allocation7 + $0x58] sm:$0xff]  ;;  %v399_v23 = vld [vmem:[#allocation7 + $0x50] sm:$0xff]  ;;  %s871_s14 = scalar_lea.vmem %s870_s16, 256  ;;  %p872_p6 = scmp.lt.s32.totalorder %s499_s30, %s870_s16 }
  0x5d   : > { %645 = vmatprep.subr.mxu0 %v940_v0  ;;  %676 = vmatprep.subr.mxu1 %v940_v0  ;;  %v398_v24 = vld [vmem:[#allocation7 + $0x48] sm:$0xff]  ;;  %v397_v25 = vld [vmem:[#allocation7 + $0x40] sm:$0xff]  ;;  %v396_v26 = vld [vmem:[#allocation7 + $0x38] sm:$0xff]  ;;  %p868_p2 = pneg %p867_p1  ;;  %p873_p12 = scmp.lt.s32.totalorder %s871_s14, %s865_s9 }
  0x5e   : > { %646 = vmatpush3.msra.mxu0 %v282_v4  ;;  %677 = vmatpush3.msra.mxu1 %v403_v19  ;;  %v395_v27 = vld [vmem:[#allocation7 + $0x30] sm:$0xff]  ;;  %v394_v28 = vld [vmem:[#allocation7 + $0x28] sm:$0xff]  ;;  %v393_v29 = vld [vmem:[#allocation7 + $0x20] sm:$0xff] }
  0x5f   : > { %647 = vmatprep.subr.mxu0 %v940_v0  ;;  %678 = vmatprep.subr.mxu1 %v940_v0  ;;  %v392_v30 = vld [vmem:[#allocation7 + $0x18] sm:$0xff]  ;;  %v391_v31 = vld [vmem:[#allocation7 + $0x10] sm:$0xff]  ;;  %v390_v32 = vld [vmem:[#allocation7 + $0x8] sm:$0xff]  ;;  %p874_p7 = por %p873_p12, %p872_p6 }
  0x60   : > { %648 = vmatpush3.msra.mxu0 %v281_v5  ;;  %679 = vmatpush3.msra.mxu1 %v402_v20  ;;  %v389_v33 = vld [vmem:[#allocation7] sm:$0xff]  ;;  %v599_v34 = vld [vmem:[%s1192_s2] ss:$0 sm:$0xff] }
  0x61   : > { %649 = vmatprep.subr.mxu0 %v940_v0  ;;  %680 = vmatprep.subr.mxu1 %v940_v0  ;;  %p875_p9 = pnand %p874_p7, %p868_p2 }
  0x62   : > { %650 = vmatpush3.msra.mxu0 %v280_v6  ;;  %681 = vmatpush3.msra.mxu1 %v401_v21 }
  0x63   : > { %651 = vmatprep.subr.mxu0 %v940_v0  ;;  %682 = vmatprep.subr.mxu1 %v940_v0 }
  0x64   : > { %652 = vmatpush3.msra.mxu0 %v279_v7  ;;  %683 = vmatpush3.msra.mxu1 %v400_v22 }
  0x65   : > { %653 = vmatprep.subr.mxu0 %v940_v0  ;;  %684 = vmatprep.subr.mxu1 %v940_v0 }
  0x66   : > { %654 = vmatpush3.msra.mxu0 %v278_v8  ;;  %685 = vmatpush3.msra.mxu1 %v399_v23 }
  0x67   : > { %655 = vmatprep.subr.mxu0 %v940_v0  ;;  %686 = vmatprep.subr.mxu1 %v940_v0 }
  0x68   : > { %656 = vmatpush3.msra.mxu0 %v277_v9  ;;  %687 = vmatpush3.msra.mxu1 %v398_v24 }
  0x69   : > { %657 = vmatprep.subr.mxu0 %v940_v0  ;;  %688 = vmatprep.subr.mxu1 %v940_v0 }
  0x6a   : > { %658 = vmatpush3.msra.mxu0 %v276_v10  ;;  %689 = vmatpush3.msra.mxu1 %v397_v25 }
  0x6b   : > { %659 = vmatprep.subr.mxu0 %v940_v0  ;;  %690 = vmatprep.subr.mxu1 %v940_v0 }
  0x6c   : > { %660 = vmatpush3.msra.mxu0 %v275_v11  ;;  %691 = vmatpush3.msra.mxu1 %v396_v26 }
  0x6d   : > { %661 = vmatprep.subr.mxu0 %v940_v0  ;;  %692 = vmatprep.subr.mxu1 %v940_v0 }
  0x6e   : > { %662 = vmatpush3.msra.mxu0 %v274_v12  ;;  %693 = vmatpush3.msra.mxu1 %v395_v27 }
  0x6f   : > { %663 = vmatprep.subr.mxu0 %v940_v0  ;;  %694 = vmatprep.subr.mxu1 %v940_v0 }
  0x70   : > { %664 = vmatpush3.msra.mxu0 %v273_v13  ;;  %695 = vmatpush3.msra.mxu1 %v394_v28 }
  0x71   : > { %665 = vmatprep.subr.mxu0 %v940_v0  ;;  %696 = vmatprep.subr.mxu1 %v940_v0 }
  0x72   : > { %666 = vmatpush3.msra.mxu0 %v272_v14  ;;  %697 = vmatpush3.msra.mxu1 %v393_v29 }
  0x73   : > { %667 = vmatprep.subr.mxu0 %v940_v0  ;;  %698 = vmatprep.subr.mxu1 %v940_v0 }
  0x74   : > { %668 = vmatpush3.msra.mxu0 %v271_v15  ;;  %699 = vmatpush3.msra.mxu1 %v392_v30 }
  0x75   : > { %669 = vmatprep.subr.mxu0 %v940_v0  ;;  %700 = vmatprep.subr.mxu1 %v940_v0 }
  0x76   : > { %670 = vmatpush3.msra.mxu0 %v270_v16  ;;  %701 = vmatpush3.msra.mxu1 %v391_v31 }
  0x77   : > { %672 = vmatmul.mubr.f32.vlgmr.msra.gmra.mxu0 %v1127_v17  ;;  %702 = vmatprep.subr.mxu1 %v940_v0 }
  0x78   : > { %703 = vmatpush3.msra.mxu1 %v390_v32 }
  0x79   : > { %704 = vmatprep.subr.mxu1 %v940_v0  ;;  %v600_v0 = vld [vmem:[%s1194_s4] ss:$0 sm:$0xff] }
  0x7a   : > { %705 = vmatpush3.msra.mxu1 %v389_v33 }
 0x137   : > { %v359_v35 = vpop.f32.mrf.mxu0 }
 0x138   : > { %v360_v36 = vadd.f32 %v599_v34, %v359_v35 }
 0x139   : > { %v673_v37 = vpop.f32.mrf.mxu0 }
 0x13a   : > { %v364_v38 = vmul.f32 0.70710677, %v360_v36  ;;  %v363_v61 = vmul.f32 0.5, %v360_v36 }
 0x13c   : > { %v367_v39 = vand.u32 2147483647, %v364_v38  ;;  %vm365_vm1 = vcmp.ge.f32.partialorder %v364_v38, 0.0 }
 0x13d   : > { %v366_v59 = vsel %vm365_vm1, 1.0, %v942_v58 }
 0x13e   : > { %v368_v40 = vmul.f32 0.3275911, %v367_v39  ;;  %v380_v42 = vsub.f32 0.0, %v367_v39 }
 0x140   : > { %v369_v41 = vadd.f32 1.0, %v368_v40  ;;  %v381_v43 = vmul.f32 %v380_v42, %v367_v39 }
 0x142   : > { %781 = vrcp.f32 %v369_v41  ;;  %v382_v45 = vmul.f32 1.442695, %v381_v43 }
 0x144   : > { %783 = vpow2.f32 %v382_v45 }
 0x14f   : > { %v782_v44 = vpop.eup %781 }
 0x150   : > { %v371_v46 = vmul.f32 1.0614054, %v782_v44 }
 0x151   : > { %v784_v55 = vpop.eup %783 }
 0x152   : > { %v372_v47 = vadd.f32 -1.4531521, %v371_v46 }
 0x154   : > { %v373_v48 = vmul.f32 %v782_v44, %v372_v47 }
 0x156   : > { %v374_v49 = vadd.f32 1.4214138, %v373_v48 }
 0x158   : > { %v375_v50 = vmul.f32 %v782_v44, %v374_v49 }
 0x15a   : > { %v376_v51 = vadd.f32 -0.28449672, %v375_v50 }
 0x15c   : > { %v377_v52 = vmul.f32 %v782_v44, %v376_v51 }
 0x15e   : > { %v378_v53 = vadd.f32 0.2548296, %v377_v52 }
 0x160   : > { %v379_v54 = vmul.f32 %v782_v44, %v378_v53 }
 0x162   : > { %v384_v56 = vmul.f32 %v784_v55, %v379_v54 }
 0x164   : > { %v385_v57 = vsub.f32 1.0, %v384_v56 }
 0x166   : > { %v386_v60 = vmul.f32 %v385_v57, %v366_v59 }
 0x168   : > { %v387_v62 = vadd.f32 1.0, %v386_v60 }
 0x16a   : > { %v388_v63 = vmul.f32 %v387_v62, %v363_v61 }
 0x16c   : > { %707 = vmatmul.mubr.f32.vlgmr.msra.gmra.mxu1 %v388_v63 }
 0x22c   : > { %v478_v1 = vpop.f32.mrf.mxu1 }
 0x22d   : > { %v479_v2 = vadd.f32 %v600_v0, %v478_v1 }
 0x22e   : > { %v708_v3 = vpop.f32.mrf.mxu1 }
 0x22f   : > { %v482_v4 = vadd.f32 %v479_v2, %v1127_v17 }
 0x231   : > { %483 = vst [vmem:[%s268_s12] sm:$0xff] %v482_v4 }
 0x232   : > { %878 = shalt.err (!%p875_p9)
}
 0x233   : > { %s879_s17 = scalar_lea.hbm %s496_s28, 128  ;;  %s883_s26 = scalar_lea.hbm %s1195_s5, 256 }
 0x234   : > { %p880_p13 = scmp.ne.s32.totalorder %s496_s28, %s879_s17  ;;  %p884_p4 = scmp.lt.s32.totalorder %s496_s28, %s1195_s5 }
 0x235   : > { %p885_p8 = scmp.lt.s32.totalorder %s883_s26, %s879_s17 }
 0x236   : > { %p881_p5 = pnand %p880_p13, %p1211_p0 }
 0x237   : > { %p886_p3 = por %p885_p8, %p884_p4 }
 0x238   : > { %p882_p10 = pneg %p881_p5 }
 0x23a   : > { %p887_p11 = pnand %p886_p3, %p882_p10 }
 0x23c   : > { %890 = shalt.err (!%p887_p11)
}
 0x23d   : > { %719 = dma.vmem_to_hbm [thread:$0]  (%p1211_p0), %s499_s30, 128, %s496_s28, %s485_s7  }
 0x23e PF: > { %s510_s11 = sand.u32 1, %s921_s18   ;;  %p1212_p1 = scmp.ne.s32.totalorder %s1201_s25, 0 }
 0x23f   : > { %p1213_p2 = scmp.ge.s32.totalorder %s933_s21, 2  ;;  %s511_s12 = scalar_lea.sflag [#allocation4], %s510_s11 }
 0x241   : > { %p733_p6 = pnand %p1213_p2, %p1212_p1 }
 0x243   : > { %p734_p12 = pneg %p733_p6 }
 0x245   : > { %916 = dma.done.wait (%p734_p12), %s511_s12, 128  }
 0x246   : > { %918 = vsyncadd (%p734_p12), %s511_s12, 4294967168  ;;  %p19_p7 = scmp.ge.s32.totalorder %s1046_s15, 4   ;;  %s1214_s18 = smov %s925_s19 }
 0x247   : > { %s1215_s19 = smov %s929_s20  ;;  %s1216_s20 = smov %s1062_s27 }
 0x248   : > { %s1217_s21 = smov %s1046_s15  ;;  %21 = sbr.rel (!%p19_p7) target bundleno = 6 (0x6), region = 93 }
 0x24d   :  { %516 = vsyncpa [#allocation3], 1 }
 0x24e   :  { %518 = vsyncpa [#allocation3 + $0x1], 1 }
 0x24f   :  { %519 = vsyncpa [#allocation6], 1 }
 0x250   :  { %520 = vsyncpa [#allocation4], 1 }
 0x251   :  { %522 = vsyncpa [#allocation4 + $0x1], 1 }

// kernel: tpu_custom_call.1
= control target key start
LH: loop header
LB: loop body
LE: loop exit
PB: predicated region body
PF: predicated region fallthrough
CT: control target
= control target key end

     0   :  { %10 = vsyncpa [#allocation3], 0  ;;  %s1190_s0 = inlined_call_operand.hbm [shape: f32[16,128], index: 0, kind: input, shape index: {}]   ;;  %s1191_s1 = inlined_call_operand.hbm [shape: f32[128,128], index: 1, kind: input, shape index: {}]   ;;  %s1192_s2 = inlined_call_operand.vmem [shape: f32[1,128], index: 2, kind: input, shape index: {}]   ;;  %s1193_s3 = inlined_call_operand.hbm [shape: f32[128,128], index: 3, kind: input, shape index: {}]   ;;  %s1194_s4 = inlined_call_operand.vmem [shape: f32[1,128], index: 4, kind: input, shape index: {}]   ;;  %s1195_s5 = inlined_call_operand.hbm [shape: f32[16,128], index: 5, kind: output, shape index: {}]  }
   0x1   :  { %12 = vsyncpa [#allocation3 + $0x1], 0 }
   0x2   :  { %13 = vsyncpa [#allocation6], 0 }
   0x3   :  { %14 = vsyncpa [#allocation4], 0 }
   0x4   :  { %16 = vsyncpa [#allocation4 + $0x1], 0  ;;  %s974_s18 = smov 0   ;;  %s976_s19 = smov 0  }
   0x5   :  { %s978_s20 = smov 0   ;;  %s980_s21 = smov 0  }
   0x6 LB: > { %s995_s22 = sadd.s32 4294967295, %s933_s21   ;;  %s587_s23 = sadd.s32 4294967294, %s933_s21   ;;  %s933_s21 = sphi %s980_s21, %s1217_s21   ;;  %s929_s20 = sphi %s978_s20, %s1216_s20   ;;  %s925_s19 = sphi %s976_s19, %s1215_s19   ;;  %s921_s18 = sphi %s974_s18, %s1214_s18  }
   0x7   : > { %p42_p0 = scmp.ne.s32.totalorder %s925_s19, %s921_s18  ;;  %p1196_p1 = scmp.eq.s32.totalorder %s995_s22, 0 }
   0x8   : > { %p156_p3 = scmp.eq.s32.totalorder %s587_s23, 1  ;;  %p588_p5 = scmp.ge.s32.totalorder %s933_s21, 1 }
   0x9   : > { %p1004_p4 = por %p1196_p1, %p42_p0  ;;  %p163_p7 = scmp.lt.s32.totalorder %s933_s21, 3 }
   0xa   : > { %p1009_p6 = por %p156_p3, %p42_p0  ;;  %s935_s27 = smov [#allocation5]  }
   0xb   : > { %s1200_s24 = scalar_select %p1004_p4, 1, 0 }
   0xc   : > { %s1201_s25 = scalar_select %p1009_p6, 1, 0 }
   0xd   : > { %p1014_p8 = pnand %p588_p5, %p163_p7  ;;  %s175_s28 = sshll.u32 %s935_s27, 4  ;;  %s176_s28 = int_to_ptr.vmem [resolvable:$true] %s175_s28 }
   0xe   : > { %s936_s30 = smov [#allocation7]   ;;  %s796_s7 = scalar_lea.vmem %s176_s28, 2048 }
   0xf   : > { %s1202_s26 = scalar_select %p1014_p8, 1, 0 }
  0x10   : > { %p721_p9 = pneg %p1014_p8  ;;  %s191_s6 = sshll.u32 %s936_s30, 4  ;;  %s192_s6 = int_to_ptr.vmem [resolvable:$true] %s191_s6 }
  0x11   : > { %p797_p13 = scmp.ne.s32.totalorder %s176_s28, %s796_s7  ;;  %p804_p5 = scmp.lt.s32.totalorder %s176_s28, %s176_s28 }
  0x12   : > { %p1023_p11 = pnand %p721_p9, %p1196_p1  ;;  %p805_p7 = scmp.lt.s32.totalorder %s796_s7, %s796_s7 }
  0x14   : > { %p787_p12 = pneg %p1023_p11  ;;  %p806_p10 = por %p805_p7, %p804_p5 }
  0x16   : > { %p799_p0 = pnand %p797_p13, %p787_p12 }
  0x18   : > { %p800_p3 = pneg %p799_p0 }
  0x1a   : > { %p807_p9 = pnand %p806_p10, %p800_p3 }
  0x1c   : > { %810 = shalt.err (!%p807_p9)
}
  0x1d   : > { %s937_s8 = smov 128   ;;  %s938_s9 = smov 8  }
  0x1e   : > { %724 = dma.hbm_to_vmem [thread:$0]  (!%p1023_p11), %s1191_s1, 2048, %s176_s28, [#allocation6], %s937_s8, %s937_s8, %s938_s9  }
  0x1f   : > { %s822_s12 = scalar_lea.vmem %s192_s6, 2048  ;;  %p830_p2 = scmp.lt.s32.totalorder %s192_s6, %s192_s6 }
  0x20   : > { %p823_p1 = scmp.ne.s32.totalorder %s192_s6, %s822_s12  ;;  %p831_p6 = scmp.lt.s32.totalorder %s822_s12, %s822_s12 }
  0x22   : > { %p825_p13 = pnand %p823_p1, %p787_p12  ;;  %p832_p5 = por %p831_p6, %p830_p2 }
  0x24   : > { %p826_p0 = pneg %p825_p13 }
  0x26   : > { %p833_p10 = pnand %p832_p5, %p826_p0 }
  0x28   : > { %836 = shalt.err (!%p833_p10)
}
  0x29   : > { %727 = dma.hbm_to_vmem [thread:$0]  (!%p1023_p11), %s1193_s3, 2048, %s192_s6, [#allocation6], %s937_s8, %s937_s8, %s938_s9  }
  0x2a   : > { %s1046_s15 = sadd.s32 1, %s933_s21   ;;  %s29_s16 = sadd.s32 1, %s929_s20 }
  0x2b   : > { %s26_s17 = ssub.s32 %s933_s21, %s1046_s15  ;;  %p36_p1 = scmp.ne.s32.totalorder %s929_s20, %s925_s19 }
  0x2c   : > { %p27_p2 = scmp.eq.s32.totalorder %s26_s17, 0  ;;  %p37_p6 = scmp.eq.s32.totalorder %s933_s21, 0 }
  0x2d   : > { %p1204_p12 = scmp.eq.s32.totalorder %s995_s22, 1  ;;  %p738_p7 = scmp.lt.s32.totalorder %s933_s21, 2 }
  0x2e   : > { %s1062_s27 = scalar_select %p27_p2, %s929_s20, %s29_s16  }
  0x2f   : > { %p1056_p3 = por %p1204_p12, %p36_p1  ;;  %p38_p9 = por %p37_p6, %p36_p1 }
  0x30   : > { %s208_s28 = sand.u32 1, %s929_s20   ;;  %s593_s30 = sshll.u32 %s933_s21, 7 }
  0x31   : > { %s1205_s23 = scalar_select %p1056_p3, 1, 0 }
  0x32   : > { %s592_s29 = sshll.u32 %s208_s28, 3  ;;  %s1069_s8 = scalar_lea.hbm %s1190_s0, %s593_s30 }
  0x33   : > { %s212_s9 = scalar_lea.vmem [#allocation2], %s592_s29  ;;  %p1071_p11 = pnand %p738_p7, %p38_p9 }
  0x34   : > { %s219_s10 = sshll.u32 %s212_s9, 4  ;;  %s209_s12 = scalar_lea.sflag [#allocation3], %s208_s28  ;;  %s220_s10 = int_to_ptr.vmem [resolvable:$true] %s219_s10 }
  0x35   : > { %s837_s13 = scalar_lea.hbm %s1069_s8, 128  ;;  %p839_p0 = pneg %p1071_p11 }
  0x36   : > { %p838_p13 = scmp.ne.s32.totalorder %s1069_s8, %s837_s13  ;;  %s842_s17 = scalar_lea.hbm %s1190_s0, 256 }
  0x37   : > { %p843_p1 = scmp.lt.s32.totalorder %s1069_s8, %s1190_s0  ;;  %p844_p2 = scmp.lt.s32.totalorder %s842_s17, %s837_s13 }
  0x38   : > { %p840_p5 = pnand %p839_p0, %p838_p13 }
  0x39   : > { %p845_p6 = por %p844_p2, %p843_p1 }
  0x3a   : > { %p841_p10 = pneg %p840_p5 }
  0x3c   : > { %p846_p12 = pnand %p845_p6, %p841_p10 }
  0x3e   : > { %849 = shalt.err (!%p846_p12)
}
  0x3f   : > { %s850_s6 = scalar_lea.vmem %s220_s10, 128  ;;  %s939_s28 = smov [#allocation2]  }
  0x40   : > { %p851_p7 = scmp.ne.s32.totalorder %s220_s10, %s850_s6  ;;  %s855_s7 = sshll.u32 %s939_s28, 4  ;;  %s856_s7 = int_to_ptr.vmem [resolvable:$false] %s855_s7 }
  0x41   : > { %s857_s9 = scalar_lea.vmem %s856_s7, 256  ;;  %p858_p13 = scmp.lt.s32.totalorder %s220_s10, %s856_s7 }
  0x42   : > { %p853_p9 = pnand %p851_p7, %p839_p0  ;;  %p859_p5 = scmp.lt.s32.totalorder %s857_s9, %s850_s6 }
  0x44   : > { %p854_p3 = pneg %p853_p9  ;;  %p860_p4 = por %p859_p5, %p858_p13 }
  0x46   : > { %p861_p8 = pnand %p860_p4, %p854_p3 }
  0x48   : > { %864 = shalt.err (!%p861_p8)
}
  0x49   : > { %731 = dma.hbm_to_vmem [thread:$0]  (!%p1071_p11), %s1069_s8, 128, %s220_s10, %s209_s12  }
  0x4a   : > { %p1207_p10 = scmp.ne.s32.totalorder %s1202_s26, 0 }
  0x4b   : > { %s1092_s13 = sand.u32 (!%p1207_p10), 1, %s925_s19   ;;  %p1208_p4 = scmp.ne.s32.totalorder (!%p1207_p10), %s1200_s24, 0 }
  0x4c   : > { %228 = sbr.rel (%p1207_p10) target bundleno = 574 (0x23e), region = 40  ;;  %s595_s14 = sshll.u32 (!%p1207_p10), %s1092_s13, 3 }
  0x4d   : > { %s231_s16 = scalar_lea.sflag (!%p1207_p10), [#allocation3], %s1092_s13  ;;  %s1098_s17 = scalar_lea.vmem (!%p1207_p10), [#allocation2], %s595_s14 }
  0x51   : > { %908 = dma.done.wait (%p1208_p4), %s231_s16, 128  }
  0x52   : > { %910 = vsyncadd (%p1208_p4), %s231_s16, 4294967168  ;;  %p1209_p8 = scmp.eq.s32.totalorder %s995_s22, 0 }
  0x54   : > { %912 = dma.done.wait (%p1209_p8), [#allocation6], 4096   ;;  %p1210_p3 = pmov %p1209_p8 }
  0x55   : > { %v940_v0 = vmov 0.0   ;;  %vm941_vm0 = vmmov 0   ;;  %v285_v1 = vld [vmem:[#allocation5 + $0x78] sm:$0xff]  ;;  %v284_v2 = vld [vmem:[#allocation5 + $0x70] sm:$0xff]  ;;  %v283_v3 = vld [vmem:[#allocation5 + $0x68] sm:$0xff]  ;;  %v942_v58 = vmov -1.0  }
  0x56   : > { %914 = vsyncadd (%p1210_p3), [#allocation6], 4294963200  ;;  %639 = vmatprep.subr.mxu0 %v940_v0  ;;  %671 = vmatprep.mubr.msk.f32.mxu0 %vm941_vm0, %v940_v0  ;;  %v282_v4 = vld [vmem:[#allocation5 + $0x60] sm:$0xff]  ;;  %v281_v5 = vld [vmem:[#allocation5 + $0x58] sm:$0xff]  ;;  %s602_s11 = sshll.u32 %s995_s22, 7  ;;  %s268_s12 = scalar_lea.vmem [#allocation8], %s595_s14 }
  0x57   : > { %674 = vmatprep.subr.mxu1 %v940_v0  ;;  %706 = vmatprep.mubr.msk.f32.mxu1 %vm941_vm0, %v940_v0  ;;  %v280_v6 = vld [vmem:[#allocation5 + $0x50] sm:$0xff]  ;;  %v279_v7 = vld [vmem:[#allocation5 + $0x48] sm:$0xff]  ;;  %v278_v8 = vld [vmem:[#allocation5 + $0x40] sm:$0xff]  ;;  %s498_s30 = sshll.u32 %s268_s12, 4  ;;  %s496_s28 = scalar_lea.hbm %s1195_s5, %s602_s11  ;;  %s499_s30 = int_to_ptr.vmem [resolvable:$true] %s498_s30 }
  0x58   : > { %640 = vmatpush3.msra.mxu0 %v285_v1  ;;  %v277_v9 = vld [vmem:[#allocation5 + $0x38] sm:$0xff]  ;;  %v276_v10 = vld [vmem:[#allocation5 + $0x30] sm:$0xff]  ;;  %v275_v11 = vld [vmem:[#allocation5 + $0x28] sm:$0xff]  ;;  %s485_s7 = scalar_lea.sflag [#allocation4], %s1092_s13  ;;  %s865_s9 = scalar_lea.vmem %s499_s30, 128 }
  0x59   : > { %641 = vmatprep.subr.mxu0 %v940_v0  ;;  %v274_v12 = vld [vmem:[#allocation5 + $0x20] sm:$0xff]  ;;  %v273_v13 = vld [vmem:[#allocation5 + $0x18] sm:$0xff]  ;;  %v272_v14 = vld [vmem:[#allocation5 + $0x10] sm:$0xff]  ;;  %p866_p11 = scmp.ne.s32.totalorder %s499_s30, %s865_s9  ;;  %p1211_p0 = scmp.ne.s32.totalorder %s1205_s23, 0 }
  0x5a   : > { %642 = vmatpush3.msra.mxu0 %v284_v2  ;;  %v271_v15 = vld [vmem:[#allocation5 + $0x8] sm:$0xff]  ;;  %v270_v16 = vld [vmem:[#allocation5] sm:$0xff]  ;;  %v1127_v17 = vld [vmem:[%s1098_s17] sm:$0xff]  ;;  %s943_s22 = smov [#allocation8]  }
  0x5b   : > { %643 = vmatprep.subr.mxu0 %v940_v0  ;;  %v404_v18 = vld [vmem:[#allocation7 + $0x78] sm:$0xff]  ;;  %v403_v19 = vld [vmem:[#allocation7 + $0x70] sm:$0xff]  ;;  %v402_v20 = vld [vmem:[#allocation7 + $0x68] sm:$0xff]  ;;  %p867_p1 = pnand %p866_p11, %p1211_p0  ;;  %s869_s16 = sshll.u32 %s943_s22, 4  ;;  %s870_s16 = int_to_ptr.vmem [resolvable:$false] %s869_s16 }
  0x5c   : > { %644 = vmatpush3.msra.mxu0 %v283_v3  ;;  %675 = vmatpush3.msra.mxu1 %v404_v18  ;;  %v401_v21 = vld [vmem:[#allocation7 + $0x60] sm:$0xff]  ;;  %v400_v22 = vld [vmem:[#allocation7 + $0x58] sm:$0xff]  ;;  %v399_v23 = vld [vmem:[#allocation7 + $0x50] sm:$0xff]  ;;  %s871_s14 = scalar_lea.vmem %s870_s16, 256  ;;  %p872_p6 = scmp.lt.s32.totalorder %s499_s30, %s870_s16 }
  0x5d   : > { %645 = vmatprep.subr.mxu0 %v940_v0  ;;  %676 = vmatprep.subr.mxu1 %v940_v0  ;;  %v398_v24 = vld [vmem:[#allocation7 + $0x48] sm:$0xff]  ;;  %v397_v25 = vld [vmem:[#allocation7 + $0x40] sm:$0xff]  ;;  %v396_v26 = vld [vmem:[#allocation7 + $0x38] sm:$0xff]  ;;  %p868_p2 = pneg %p867_p1  ;;  %p873_p12 = scmp.lt.s32.totalorder %s871_s14, %s865_s9 }
  0x5e   : > { %646 = vmatpush3.msra.mxu0 %v282_v4  ;;  %677 = vmatpush3.msra.mxu1 %v403_v19  ;;  %v395_v27 = vld [vmem:[#allocation7 + $0x30] sm:$0xff]  ;;  %v394_v28 = vld [vmem:[#allocation7 + $0x28] sm:$0xff]  ;;  %v393_v29 = vld [vmem:[#allocation7 + $0x20] sm:$0xff] }
  0x5f   : > { %647 = vmatprep.subr.mxu0 %v940_v0  ;;  %678 = vmatprep.subr.mxu1 %v940_v0  ;;  %v392_v30 = vld [vmem:[#allocation7 + $0x18] sm:$0xff]  ;;  %v391_v31 = vld [vmem:[#allocation7 + $0x10] sm:$0xff]  ;;  %v390_v32 = vld [vmem:[#allocation7 + $0x8] sm:$0xff]  ;;  %p874_p7 = por %p873_p12, %p872_p6 }
  0x60   : > { %648 = vmatpush3.msra.mxu0 %v281_v5  ;;  %679 = vmatpush3.msra.mxu1 %v402_v20  ;;  %v389_v33 = vld [vmem:[#allocation7] sm:$0xff]  ;;  %v599_v34 = vld [vmem:[%s1192_s2] ss:$0 sm:$0xff] }
  0x61   : > { %649 = vmatprep.subr.mxu0 %v940_v0  ;;  %680 = vmatprep.subr.mxu1 %v940_v0  ;;  %p875_p9 = pnand %p874_p7, %p868_p2 }
  0x62   : > { %650 = vmatpush3.msra.mxu0 %v280_v6  ;;  %681 = vmatpush3.msra.mxu1 %v401_v21 }
  0x63   : > { %651 = vmatprep.subr.mxu0 %v940_v0  ;;  %682 = vmatprep.subr.mxu1 %v940_v0 }
  0x64   : > { %652 = vmatpush3.msra.mxu0 %v279_v7  ;;  %683 = vmatpush3.msra.mxu1 %v400_v22 }
  0x65   : > { %653 = vmatprep.subr.mxu0 %v940_v0  ;;  %684 = vmatprep.subr.mxu1 %v940_v0 }
  0x66   : > { %654 = vmatpush3.msra.mxu0 %v278_v8  ;;  %685 = vmatpush3.msra.mxu1 %v399_v23 }
  0x67   : > { %655 = vmatprep.subr.mxu0 %v940_v0  ;;  %686 = vmatprep.subr.mxu1 %v940_v0 }
  0x68   : > { %656 = vmatpush3.msra.mxu0 %v277_v9  ;;  %687 = vmatpush3.msra.mxu1 %v398_v24 }
  0x69   : > { %657 = vmatprep.subr.mxu0 %v940_v0  ;;  %688 = vmatprep.subr.mxu1 %v940_v0 }
  0x6a   : > { %658 = vmatpush3.msra.mxu0 %v276_v10  ;;  %689 = vmatpush3.msra.mxu1 %v397_v25 }
  0x6b   : > { %659 = vmatprep.subr.mxu0 %v940_v0  ;;  %690 = vmatprep.subr.mxu1 %v940_v0 }
  0x6c   : > { %660 = vmatpush3.msra.mxu0 %v275_v11  ;;  %691 = vmatpush3.msra.mxu1 %v396_v26 }
  0x6d   : > { %661 = vmatprep.subr.mxu0 %v940_v0  ;;  %692 = vmatprep.subr.mxu1 %v940_v0 }
  0x6e   : > { %662 = vmatpush3.msra.mxu0 %v274_v12  ;;  %693 = vmatpush3.msra.mxu1 %v395_v27 }
  0x6f   : > { %663 = vmatprep.subr.mxu0 %v940_v0  ;;  %694 = vmatprep.subr.mxu1 %v940_v0 }
  0x70   : > { %664 = vmatpush3.msra.mxu0 %v273_v13  ;;  %695 = vmatpush3.msra.mxu1 %v394_v28 }
  0x71   : > { %665 = vmatprep.subr.mxu0 %v940_v0  ;;  %696 = vmatprep.subr.mxu1 %v940_v0 }
  0x72   : > { %666 = vmatpush3.msra.mxu0 %v272_v14  ;;  %697 = vmatpush3.msra.mxu1 %v393_v29 }
  0x73   : > { %667 = vmatprep.subr.mxu0 %v940_v0  ;;  %698 = vmatprep.subr.mxu1 %v940_v0 }
  0x74   : > { %668 = vmatpush3.msra.mxu0 %v271_v15  ;;  %699 = vmatpush3.msra.mxu1 %v392_v30 }
  0x75   : > { %669 = vmatprep.subr.mxu0 %v940_v0  ;;  %700 = vmatprep.subr.mxu1 %v940_v0 }
  0x76   : > { %670 = vmatpush3.msra.mxu0 %v270_v16  ;;  %701 = vmatpush3.msra.mxu1 %v391_v31 }
  0x77   : > { %672 = vmatmul.mubr.f32.vlgmr.msra.gmra.mxu0 %v1127_v17  ;;  %702 = vmatprep.subr.mxu1 %v940_v0 }
  0x78   : > { %703 = vmatpush3.msra.mxu1 %v390_v32 }
  0x79   : > { %704 = vmatprep.subr.mxu1 %v940_v0  ;;  %v600_v0 = vld [vmem:[%s1194_s4] ss:$0 sm:$0xff] }
  0x7a   : > { %705 = vmatpush3.msra.mxu1 %v389_v33 }
 0x137   : > { %v359_v35 = vpop.f32.mrf.mxu0 }
 0x138   : > { %v360_v36 = vadd.f32 %v599_v34, %v359_v35 }
 0x139   : > { %v673_v37 = vpop.f32.mrf.mxu0 }
 0x13a   : > { %v364_v38 = vmul.f32 0.70710677, %v360_v36  ;;  %v363_v61 = vmul.f32 0.5, %v360_v36 }
 0x13c   : > { %v367_v39 = vand.u32 2147483647, %v364_v38  ;;  %vm365_vm1 = vcmp.ge.f32.partialorder %v364_v38, 0.0 }
 0x13d   : > { %v366_v59 = vsel %vm365_vm1, 1.0, %v942_v58 }
 0x13e   : > { %v368_v40 = vmul.f32 0.3275911, %v367_v39  ;;  %v380_v42 = vsub.f32 0.0, %v367_v39 }
 0x140   : > { %v369_v41 = vadd.f32 1.0, %v368_v40  ;;  %v381_v43 = vmul.f32 %v380_v42, %v367_v39 }
 0x142   : > { %781 = vrcp.f32 %v369_v41  ;;  %v382_v45 = vmul.f32 1.442695, %v381_v43 }
 0x144   : > { %783 = vpow2.f32 %v382_v45 }
 0x14f   : > { %v782_v44 = vpop.eup %781 }
 0x150   : > { %v371_v46 = vmul.f32 1.0614054, %v782_v44 }
 0x151   : > { %v784_v55 = vpop.eup %783 }
 0x152   : > { %v372_v47 = vadd.f32 -1.4531521, %v371_v46 }
 0x154   : > { %v373_v48 = vmul.f32 %v782_v44, %v372_v47 }
 0x156   : > { %v374_v49 = vadd.f32 1.4214138, %v373_v48 }
 0x158   : > { %v375_v50 = vmul.f32 %v782_v44, %v374_v49 }
 0x15a   : > { %v376_v51 = vadd.f32 -0.28449672, %v375_v50 }
 0x15c   : > { %v377_v52 = vmul.f32 %v782_v44, %v376_v51 }
 0x15e   : > { %v378_v53 = vadd.f32 0.2548296, %v377_v52 }
 0x160   : > { %v379_v54 = vmul.f32 %v782_v44, %v378_v53 }
 0x162   : > { %v384_v56 = vmul.f32 %v784_v55, %v379_v54 }
 0x164   : > { %v385_v57 = vsub.f32 1.0, %v384_v56 }
 0x166   : > { %v386_v60 = vmul.f32 %v385_v57, %v366_v59 }
 0x168   : > { %v387_v62 = vadd.f32 1.0, %v386_v60 }
 0x16a   : > { %v388_v63 = vmul.f32 %v387_v62, %v363_v61 }
 0x16c   : > { %707 = vmatmul.mubr.f32.vlgmr.msra.gmra.mxu1 %v388_v63 }
 0x22c   : > { %v478_v1 = vpop.f32.mrf.mxu1 }
 0x22d   : > { %v479_v2 = vadd.f32 %v600_v0, %v478_v1 }
 0x22e   : > { %v708_v3 = vpop.f32.mrf.mxu1 }
 0x22f   : > { %v482_v4 = vadd.f32 %v479_v2, %v1127_v17 }
 0x231   : > { %483 = vst [vmem:[%s268_s12] sm:$0xff] %v482_v4 }
 0x232   : > { %878 = shalt.err (!%p875_p9)
}
 0x233   : > { %s879_s17 = scalar_lea.hbm %s496_s28, 128  ;;  %s883_s26 = scalar_lea.hbm %s1195_s5, 256 }
 0x234   : > { %p880_p13 = scmp.ne.s32.totalorder %s496_s28, %s879_s17  ;;  %p884_p4 = scmp.lt.s32.totalorder %s496_s28, %s1195_s5 }
 0x235   : > { %p885_p8 = scmp.lt.s32.totalorder %s883_s26, %s879_s17 }
 0x236   : > { %p881_p5 = pnand %p880_p13, %p1211_p0 }
 0x237   : > { %p886_p3 = por %p885_p8, %p884_p4 }
 0x238   : > { %p882_p10 = pneg %p881_p5 }
 0x23a   : > { %p887_p11 = pnand %p886_p3, %p882_p10 }
 0x23c   : > { %890 = shalt.err (!%p887_p11)
}
 0x23d   : > { %719 = dma.vmem_to_hbm [thread:$0]  (%p1211_p0), %s499_s30, 128, %s496_s28, %s485_s7  }
 0x23e PF: > { %s510_s11 = sand.u32 1, %s921_s18   ;;  %p1212_p1 = scmp.ne.s32.totalorder %s1201_s25, 0 }
 0x23f   : > { %p1213_p2 = scmp.ge.s32.totalorder %s933_s21, 2  ;;  %s511_s12 = scalar_lea.sflag [#allocation4], %s510_s11 }
 0x241   : > { %p733_p6 = pnand %p1213_p2, %p1212_p1 }
 0x243   : > { %p734_p12 = pneg %p733_p6 }
 0x245   : > { %916 = dma.done.wait (%p734_p12), %s511_s12, 128  }
 0x246   : > { %918 = vsyncadd (%p734_p12), %s511_s12, 4294967168  ;;  %p19_p7 = scmp.ge.s32.totalorder %s1046_s15, 4   ;;  %s1214_s18 = smov %s925_s19 }
 0x247   : > { %s1215_s19 = smov %s929_s20  ;;  %s1216_s20 = smov %s1062_s27 }
 0x248   : > { %s1217_s21 = smov %s1046_s15  ;;  %21 = sbr.rel (!%p19_p7) target bundleno = 6 (0x6), region = 93 }
 0x24d   :  { %516 = vsyncpa [#allocation3], 1 }
 0x24e   :  { %518 = vsyncpa [#allocation3 + $0x1], 1 }
 0x24f   :  { %519 = vsyncpa [#allocation6], 1 }
 0x250   :  { %520 = vsyncpa [#allocation4], 1 }
 0x251   :  { %522 = vsyncpa [#allocation4 + $0x1], 1 }

</bundles_post_ra>
